<compile_context>
chip_gen: v7x
topology: tpu7x:2x2x1
jax: 0.10.0
libtpu: 0.0.40
codegen_flags: <defaults>
</compile_context>

<pallas_src>
import jax
import jax.numpy as jnp
from jax.experimental import pallas as pl
from jax.experimental.pallas import tpu as pltpu


def _make_gather_mse_kernel(num_modalities, num_valid, block_b):
    """Kernel for one group of modalities sharing feature dim & dtype."""

    def kernel(idx_ref, mod_ref, pred_ref, *args):
        # idx_ref : SMEM (Np,)  int32  flat row index (b*T_m + len_b - 1)
        # mod_ref : SMEM (Np,)  int32  which modality HBM ref each example uses
        # pred_ref: VMEM (TB, D)       predictions for this block of examples
        # args    : M HBM refs (inputs flattened to (B*T_m, D)),
        #           out_ref (TB, D) f32 accumulator,
        #           rowbuf VMEM (TB, D), sems = DMA semaphores (TB,)
        inp_refs = args[:num_modalities]
        out_ref = args[num_modalities]
        rowbuf = args[num_modalities + 1]
        sems = args[num_modalities + 2]

        step = pl.program_id(0)
        base = step * block_b

        @pl.when(step == 0)
        def _init():
            out_ref[...] = jnp.zeros_like(out_ref)

        # Gather only the target rows: one tiny async copy per example,
        # all TB of them in flight at once, then wait.
        waits = []
        for j in range(block_b):
            ex = base + j
            ridx = idx_ref[ex]
            dst = rowbuf.at[pl.ds(j, 1), :]
            if num_modalities == 1:
                pltpu.make_async_copy(
                    inp_refs[0].at[pl.ds(ridx, 1), :], dst, sems.at[j]).start()
            else:
                mod = mod_ref[ex]
                for m in range(num_modalities):
                    @pl.when(mod == m)
                    def _start(m=m, ridx=ridx, dst=dst, j=j):
                        pltpu.make_async_copy(
                            inp_refs[m].at[pl.ds(ridx, 1), :], dst,
                            sems.at[j]).start()
            # Wait descriptor only needs a matching dst shape + semaphore.
            waits.append(pltpu.make_async_copy(
                inp_refs[0].at[pl.ds(0, 1), :], dst, sems.at[j]))
        for cp in waits:
            cp.wait()

        diff = pred_ref[...].astype(jnp.float32) - rowbuf[...].astype(jnp.float32)
        sq = diff * diff
        # Mask out padded examples (example axis padded up to a multiple of TB).
        rows = jax.lax.broadcasted_iota(jnp.int32, sq.shape, 0) + base
        sq = jnp.where(rows < num_valid, sq, 0.0)
        out_ref[...] = out_ref[...] + sq

    return kernel


def _group_loss_sum(items, lengths, feat_dim, block_b):
    """Sum over examples of mean_d((pred[b] - inp[b, len_b-1])**2) for one
    group of modalities sharing (feature dim, dtype). Returns (sum, n)."""
    preds, idxs, mods, inp_flats = [], [], [], []
    for m, (pred, inp) in enumerate(items):
        b, t, d = inp.shape
        assert d == feat_dim and pred.shape == (b, d)
        preds.append(pred)
        inp_flats.append(inp.reshape(b * t, d))       # metadata-only reshape
        idxs.append(jnp.arange(b, dtype=jnp.int32) * t
                    + (lengths[:b].astype(jnp.int32) - 1))
        mods.append(jnp.full((b,), m, dtype=jnp.int32))

    pred_all = jnp.concatenate(preds, axis=0) if len(preds) > 1 else preds[0]
    idx_all = jnp.concatenate(idxs, axis=0) if len(idxs) > 1 else idxs[0]
    mod_all = jnp.concatenate(mods, axis=0) if len(mods) > 1 else mods[0]

    n = pred_all.shape[0]
    n_pad = -(-n // block_b) * block_b
    if n_pad != n:
        pad = n_pad - n
        pred_all = jnp.concatenate(
            [pred_all, jnp.zeros((pad, feat_dim), pred_all.dtype)], axis=0)
        idx_all = jnp.concatenate([idx_all, jnp.zeros((pad,), jnp.int32)], 0)
        mod_all = jnp.concatenate([mod_all, jnp.zeros((pad,), jnp.int32)], 0)

    num_modalities = len(items)
    inp_dtype = inp_flats[0].dtype
    kernel = _make_gather_mse_kernel(num_modalities, n, block_b)

    out = pl.pallas_call(
        kernel,
        out_shape=jax.ShapeDtypeStruct((block_b, feat_dim), jnp.float32),
        grid_spec=pltpu.PrefetchScalarGridSpec(
            num_scalar_prefetch=2,
            grid=(n_pad // block_b,),
            in_specs=[pl.BlockSpec((block_b, feat_dim),
                                   lambda i, idx, mod: (i, 0))]
                     + [pl.BlockSpec(memory_space=pl.ANY)] * num_modalities,
            out_specs=pl.BlockSpec((block_b, feat_dim),
                                   lambda i, idx, mod: (0, 0)),
            scratch_shapes=[
                pltpu.VMEM((block_b, feat_dim), inp_dtype),
                pltpu.SemaphoreType.DMA((block_b,)),
            ],
        ),
        compiler_params=pltpu.CompilerParams(
            dimension_semantics=("arbitrary",)),
    )(idx_all, mod_all, pred_all, *inp_flats)

    # Single cross-lane reduction + per-example mean normalization, done once.
    return jnp.sum(out) / jnp.float32(feat_dim), n


def time_series_regression_mse_loss(predicted_modalities, input_modalities,
                                    lengths, block_b=8):
    """JAX/Pallas equivalent of TimeSeriesRegressionMSELoss.forward."""
    lengths = jnp.asarray(lengths, dtype=jnp.int32)
    groups = {}
    for pred, inp in zip(predicted_modalities, input_modalities):
        key = (pred.shape[-1], jnp.dtype(inp.dtype))
        groups.setdefault(key, []).append((pred, inp))

    total = jnp.float32(0.0)
    count = 0
    for (d, _), items in groups.items():
        s, n = _group_loss_sum(items, lengths, d, block_b)
        total = total + s
        count += n
    return total / jnp.float32(count)


def _reference_loss(predicted_modalities, input_modalities, lengths):
    """Pure-JAX reference mirroring the PyTorch loops."""
    loss = jnp.float32(0.0)
    count = 0
    for pred, inp in zip(predicted_modalities, input_modalities):
        for b in range(pred.shape[0]):
            l = int(lengths[b])
            diff = pred[b].astype(jnp.float32) - inp[b, l - 1].astype(jnp.float32)
            loss = loss + jnp.mean(diff * diff)
            count += 1
    return loss / count


if __name__ == "__main__":
    key = jax.random.PRNGKey(0)

    # 3 modalities, batch B=2:
    #   two modalities share D=32 (fused into one pallas_call, with different
    #   sequence lengths T=16 / T=24), one modality has D=64 (its own call).
    B = 2
    lengths = jnp.array([12, 16], dtype=jnp.int32)
    shapes = [(B, 16, 32), (B, 24, 32), (B, 16, 64)]

    keys = jax.random.split(key, 2 * len(shapes))
    predicted_modalities = []
    input_modalities = []
    for i, (b, t, d) in enumerate(shapes):
        predicted_modalities.append(
            jax.random.normal(keys[2 * i], (b, d), dtype=jnp.float32))
        input_modalities.append(
            jax.random.normal(keys[2 * i + 1], (b, t, d), dtype=jnp.float32))

    loss = time_series_regression_mse_loss(
        predicted_modalities, input_modalities, lengths)
    loss = jax.block_until_ready(loss)

    ref = _reference_loss(predicted_modalities, input_modalities, lengths)
    assert jnp.allclose(loss, ref, rtol=1e-5, atol=1e-6), (loss, ref)

    print("KERNEL_OK")
</pallas_src>

<mosaic_0001>
module attributes {stable_mosaic.version = 11 : i64} {
  func.func @kernel(%arg0: i32, %arg1: memref<8xi32, #tpu.memory_space<smem>>, %arg2: memref<8xi32, #tpu.memory_space<smem>>, %arg3: memref<8x32xf32, #tpu.memory_space<vmem>>, %arg4: memref<32x32xf32, #tpu.memory_space<any>>, %arg5: memref<48x32xf32, #tpu.memory_space<any>>, %arg6: memref<8x32xf32, #tpu.memory_space<vmem>>, %arg7: memref<8x32xf32, #tpu.memory_space<vmem>>, %arg8: memref<8x!tpu.dma_semaphore, #tpu.memory_space<semaphore_mem>>) attributes {dimension_semantics = [#tpu.dimension_semantics<arbitrary>], iteration_bounds = array<i64: 1>, scalar_prefetch = 2 : i64, scratch_operands = 2 : i64, tpu.core_type = #tpu.core_type<tc>, window_params = [{transform_indices = @transform_0, window_bounds = array<i64: 8, 32>}, {}, {}, {pipeline_mode = #tpu.pipeline_mode<synchronous>, transform_indices = @transform_3, window_bounds = array<i64: 8, 32>}]} {
    %c8_i32 = arith.constant 8 : i32
    %0 = arith.muli %arg0, %c8_i32 : i32
    %c0_i32 = arith.constant 0 : i32
    %1 = arith.cmpi eq, %arg0, %c0_i32 : i32
    %2 = arith.extui %1 : i1 to i32
    %c0_i32_0 = arith.constant 0 : i32
    %3 = arith.cmpi ne, %2, %c0_i32_0 : i32
    scf.if %3 {
      %cst_82 = arith.constant 0.000000e+00 : f32
      %138 = vector.broadcast %cst_82 : f32 to vector<8x32xf32>
      %c0_83 = arith.constant 0 : index
      %c0_84 = arith.constant 0 : index
      %139 = vector.load %arg6[%c0_83, %c0_84] : memref<8x32xf32, #tpu.memory_space<vmem>>, vector<8x32xf32>
      tpu.vector_store %arg6[%c0_83, %c0_84], %138 {strides = array<i32>} : memref<8x32xf32, #tpu.memory_space<vmem>>, vector<8x32xf32>,
    } else {
    }
    %c0_i32_1 = arith.constant 0 : i32
    %4 = arith.addi %0, %c0_i32_1 : i32
    %5 = arith.index_cast %4 : i32 to index
    %6 = memref.load %arg1[%5] : memref<8xi32, #tpu.memory_space<smem>>
    %7 = arith.index_cast %4 : i32 to index
    %8 = memref.load %arg2[%7] : memref<8xi32, #tpu.memory_space<smem>>
    %c0_i32_2 = arith.constant 0 : i32
    %9 = arith.cmpi eq, %8, %c0_i32_2 : i32
    %10 = arith.extui %9 : i1 to i32
    %c0_i32_3 = arith.constant 0 : i32
    %11 = arith.cmpi ne, %10, %c0_i32_3 : i32
    scf.if %11 {
      %c0_i32_82 = arith.constant 0 : i32
      %c0_i32_83 = arith.constant 0 : i32
      %138 = tpu.memref_slice %arg4[%6, %c0_i32_83] : memref<32x32xf32, #tpu.memory_space<any>> -> memref<1x32xf32, #tpu.memory_space<any>>
      %c0_i32_84 = arith.constant 0 : i32
      %c0_i32_85 = arith.constant 0 : i32
      %139 = tpu.memref_slice %arg7[%c0_i32_84, %c0_i32_85] : memref<8x32xf32, #tpu.memory_space<vmem>> -> memref<1x32xf32, #tpu.memory_space<vmem>>
      %140 = tpu.memref_slice %arg8[%c0_i32_82] : memref<8x!tpu.dma_semaphore, #tpu.memory_space<semaphore_mem>> -> memref<1x!tpu.dma_semaphore, #tpu.memory_space<semaphore_mem>>
      %141 = tpu.memref_squeeze %140 : memref<1x!tpu.dma_semaphore, #tpu.memory_space<semaphore_mem>> -> memref<!tpu.dma_semaphore, #tpu.memory_space<semaphore_mem>>
      tpu.enqueue_dma source(%138 : memref<1x32xf32, #tpu.memory_space<any>>) target(%139 : memref<1x32xf32, #tpu.memory_space<vmem>>) target_semaphore(%141 : memref<!tpu.dma_semaphore, #tpu.memory_space<semaphore_mem>>)
    } else {
    }
    %c1_i32 = arith.constant 1 : i32
    %12 = arith.cmpi eq, %8, %c1_i32 : i32
    %13 = arith.extui %12 : i1 to i32
    %c0_i32_4 = arith.constant 0 : i32
    %14 = arith.cmpi ne, %13, %c0_i32_4 : i32
    scf.if %14 {
      %c0_i32_82 = arith.constant 0 : i32
      %c0_i32_83 = arith.constant 0 : i32
      %138 = tpu.memref_slice %arg5[%6, %c0_i32_83] : memref<48x32xf32, #tpu.memory_space<any>> -> memref<1x32xf32, #tpu.memory_space<any>>
      %c0_i32_84 = arith.constant 0 : i32
      %c0_i32_85 = arith.constant 0 : i32
      %139 = tpu.memref_slice %arg7[%c0_i32_84, %c0_i32_85] : memref<8x32xf32, #tpu.memory_space<vmem>> -> memref<1x32xf32, #tpu.memory_space<vmem>>
      %140 = tpu.memref_slice %arg8[%c0_i32_82] : memref<8x!tpu.dma_semaphore, #tpu.memory_space<semaphore_mem>> -> memref<1x!tpu.dma_semaphore, #tpu.memory_space<semaphore_mem>>
      %141 = tpu.memref_squeeze %140 : memref<1x!tpu.dma_semaphore, #tpu.memory_space<semaphore_mem>> -> memref<!tpu.dma_semaphore, #tpu.memory_space<semaphore_mem>>
      tpu.enqueue_dma source(%138 : memref<1x32xf32, #tpu.memory_space<any>>) target(%139 : memref<1x32xf32, #tpu.memory_space<vmem>>) target_semaphore(%141 : memref<!tpu.dma_semaphore, #tpu.memory_space<semaphore_mem>>)
    } else {
    }
    %c1_i32_5 = arith.constant 1 : i32
    %15 = arith.addi %0, %c1_i32_5 : i32
    %16 = arith.index_cast %15 : i32 to index
    %17 = memref.load %arg1[%16] : memref<8xi32, #tpu.memory_space<smem>>
    %18 = arith.index_cast %15 : i32 to index
    %19 = memref.load %arg2[%18] : memref<8xi32, #tpu.memory_space<smem>>
    %c0_i32_6 = arith.constant 0 : i32
    %20 = arith.cmpi eq, %19, %c0_i32_6 : i32
    %21 = arith.extui %20 : i1 to i32
    %c0_i32_7 = arith.constant 0 : i32
    %22 = arith.cmpi ne, %21, %c0_i32_7 : i32
    scf.if %22 {
      %c1_i32_82 = arith.constant 1 : i32
      %c0_i32_83 = arith.constant 0 : i32
      %138 = tpu.memref_slice %arg4[%17, %c0_i32_83] : memref<32x32xf32, #tpu.memory_space<any>> -> memref<1x32xf32, #tpu.memory_space<any>>
      %c1_i32_84 = arith.constant 1 : i32
      %c0_i32_85 = arith.constant 0 : i32
      %139 = tpu.memref_slice %arg7[%c1_i32_84, %c0_i32_85] : memref<8x32xf32, #tpu.memory_space<vmem>> -> memref<1x32xf32, #tpu.memory_space<vmem>>
      %140 = tpu.memref_slice %arg8[%c1_i32_82] : memref<8x!tpu.dma_semaphore, #tpu.memory_space<semaphore_mem>> -> memref<1x!tpu.dma_semaphore, #tpu.memory_space<semaphore_mem>>
      %141 = tpu.memref_squeeze %140 : memref<1x!tpu.dma_semaphore, #tpu.memory_space<semaphore_mem>> -> memref<!tpu.dma_semaphore, #tpu.memory_space<semaphore_mem>>
      tpu.enqueue_dma source(%138 : memref<1x32xf32, #tpu.memory_space<any>>) target(%139 : memref<1x32xf32, #tpu.memory_space<vmem>>) target_semaphore(%141 : memref<!tpu.dma_semaphore, #tpu.memory_space<semaphore_mem>>)
    } else {
    }
    %c1_i32_8 = arith.constant 1 : i32
    %23 = arith.cmpi eq, %19, %c1_i32_8 : i32
    %24 = arith.extui %23 : i1 to i32
    %c0_i32_9 = arith.constant 0 : i32
    %25 = arith.cmpi ne, %24, %c0_i32_9 : i32
    scf.if %25 {
      %c1_i32_82 = arith.constant 1 : i32
      %c0_i32_83 = arith.constant 0 : i32
      %138 = tpu.memref_slice %arg5[%17, %c0_i32_83] : memref<48x32xf32, #tpu.memory_space<any>> -> memref<1x32xf32, #tpu.memory_space<any>>
      %c1_i32_84 = arith.constant 1 : i32
      %c0_i32_85 = arith.constant 0 : i32
      %139 = tpu.memref_slice %arg7[%c1_i32_84, %c0_i32_85] : memref<8x32xf32, #tpu.memory_space<vmem>> -> memref<1x32xf32, #tpu.memory_space<vmem>>
      %140 = tpu.memref_slice %arg8[%c1_i32_82] : memref<8x!tpu.dma_semaphore, #tpu.memory_space<semaphore_mem>> -> memref<1x!tpu.dma_semaphore, #tpu.memory_space<semaphore_mem>>
      %141 = tpu.memref_squeeze %140 : memref<1x!tpu.dma_semaphore, #tpu.memory_space<semaphore_mem>> -> memref<!tpu.dma_semaphore, #tpu.memory_space<semaphore_mem>>
      tpu.enqueue_dma source(%138 : memref<1x32xf32, #tpu.memory_space<any>>) target(%139 : memref<1x32xf32, #tpu.memory_space<vmem>>) target_semaphore(%141 : memref<!tpu.dma_semaphore, #tpu.memory_space<semaphore_mem>>)
    } else {
    }
    %c2_i32 = arith.constant 2 : i32
    %26 = arith.addi %0, %c2_i32 : i32
    %27 = arith.index_cast %26 : i32 to index
    %28 = memref.load %arg1[%27] : memref<8xi32, #tpu.memory_space<smem>>
    %29 = arith.index_cast %26 : i32 to index
    %30 = memref.load %arg2[%29] : memref<8xi32, #tpu.memory_space<smem>>
    %c0_i32_10 = arith.constant 0 : i32
    %31 = arith.cmpi eq, %30, %c0_i32_10 : i32
    %32 = arith.extui %31 : i1 to i32
    %c0_i32_11 = arith.constant 0 : i32
    %33 = arith.cmpi ne, %32, %c0_i32_11 : i32
    scf.if %33 {
      %c2_i32_82 = arith.constant 2 : i32
      %c0_i32_83 = arith.constant 0 : i32
      %138 = tpu.memref_slice %arg4[%28, %c0_i32_83] : memref<32x32xf32, #tpu.memory_space<any>> -> memref<1x32xf32, #tpu.memory_space<any>>
      %c2_i32_84 = arith.constant 2 : i32
      %c0_i32_85 = arith.constant 0 : i32
      %139 = tpu.memref_slice %arg7[%c2_i32_84, %c0_i32_85] : memref<8x32xf32, #tpu.memory_space<vmem>> -> memref<1x32xf32, #tpu.memory_space<vmem>>
      %140 = tpu.memref_slice %arg8[%c2_i32_82] : memref<8x!tpu.dma_semaphore, #tpu.memory_space<semaphore_mem>> -> memref<1x!tpu.dma_semaphore, #tpu.memory_space<semaphore_mem>>
      %141 = tpu.memref_squeeze %140 : memref<1x!tpu.dma_semaphore, #tpu.memory_space<semaphore_mem>> -> memref<!tpu.dma_semaphore, #tpu.memory_space<semaphore_mem>>
      tpu.enqueue_dma source(%138 : memref<1x32xf32, #tpu.memory_space<any>>) target(%139 : memref<1x32xf32, #tpu.memory_space<vmem>>) target_semaphore(%141 : memref<!tpu.dma_semaphore, #tpu.memory_space<semaphore_mem>>)
    } else {
    }
    %c1_i32_12 = arith.constant 1 : i32
    %34 = arith.cmpi eq, %30, %c1_i32_12 : i32
    %35 = arith.extui %34 : i1 to i32
    %c0_i32_13 = arith.constant 0 : i32
    %36 = arith.cmpi ne, %35, %c0_i32_13 : i32
    scf.if %36 {
      %c2_i32_82 = arith.constant 2 : i32
      %c0_i32_83 = arith.constant 0 : i32
      %138 = tpu.memref_slice %arg5[%28, %c0_i32_83] : memref<48x32xf32, #tpu.memory_space<any>> -> memref<1x32xf32, #tpu.memory_space<any>>
      %c2_i32_84 = arith.constant 2 : i32
      %c0_i32_85 = arith.constant 0 : i32
      %139 = tpu.memref_slice %arg7[%c2_i32_84, %c0_i32_85] : memref<8x32xf32, #tpu.memory_space<vmem>> -> memref<1x32xf32, #tpu.memory_space<vmem>>
      %140 = tpu.memref_slice %arg8[%c2_i32_82] : memref<8x!tpu.dma_semaphore, #tpu.memory_space<semaphore_mem>> -> memref<1x!tpu.dma_semaphore, #tpu.memory_space<semaphore_mem>>
      %141 = tpu.memref_squeeze %140 : memref<1x!tpu.dma_semaphore, #tpu.memory_space<semaphore_mem>> -> memref<!tpu.dma_semaphore, #tpu.memory_space<semaphore_mem>>
      tpu.enqueue_dma source(%138 : memref<1x32xf32, #tpu.memory_space<any>>) target(%139 : memref<1x32xf32, #tpu.memory_space<vmem>>) target_semaphore(%141 : memref<!tpu.dma_semaphore, #tpu.memory_space<semaphore_mem>>)
    } else {
    }
    %c3_i32 = arith.constant 3 : i32
    %37 = arith.addi %0, %c3_i32 : i32
    %38 = arith.index_cast %37 : i32 to index
    %39 = memref.load %arg1[%38] : memref<8xi32, #tpu.memory_space<smem>>
    %40 = arith.index_cast %37 : i32 to index
    %41 = memref.load %arg2[%40] : memref<8xi32, #tpu.memory_space<smem>>
    %c0_i32_14 = arith.constant 0 : i32
    %42 = arith.cmpi eq, %41, %c0_i32_14 : i32
    %43 = arith.extui %42 : i1 to i32
    %c0_i32_15 = arith.constant 0 : i32
    %44 = arith.cmpi ne, %43, %c0_i32_15 : i32
    scf.if %44 {
      %c3_i32_82 = arith.constant 3 : i32
      %c0_i32_83 = arith.constant 0 : i32
      %138 = tpu.memref_slice %arg4[%39, %c0_i32_83] : memref<32x32xf32, #tpu.memory_space<any>> -> memref<1x32xf32, #tpu.memory_space<any>>
      %c3_i32_84 = arith.constant 3 : i32
      %c0_i32_85 = arith.constant 0 : i32
      %139 = tpu.memref_slice %arg7[%c3_i32_84, %c0_i32_85] : memref<8x32xf32, #tpu.memory_space<vmem>> -> memref<1x32xf32, #tpu.memory_space<vmem>>
      %140 = tpu.memref_slice %arg8[%c3_i32_82] : memref<8x!tpu.dma_semaphore, #tpu.memory_space<semaphore_mem>> -> memref<1x!tpu.dma_semaphore, #tpu.memory_space<semaphore_mem>>
      %141 = tpu.memref_squeeze %140 : memref<1x!tpu.dma_semaphore, #tpu.memory_space<semaphore_mem>> -> memref<!tpu.dma_semaphore, #tpu.memory_space<semaphore_mem>>
      tpu.enqueue_dma source(%138 : memref<1x32xf32, #tpu.memory_space<any>>) target(%139 : memref<1x32xf32, #tpu.memory_space<vmem>>) target_semaphore(%141 : memref<!tpu.dma_semaphore, #tpu.memory_space<semaphore_mem>>)
    } else {
    }
    %c1_i32_16 = arith.constant 1 : i32
    %45 = arith.cmpi eq, %41, %c1_i32_16 : i32
    %46 = arith.extui %45 : i1 to i32
    %c0_i32_17 = arith.constant 0 : i32
    %47 = arith.cmpi ne, %46, %c0_i32_17 : i32
    scf.if %47 {
      %c3_i32_82 = arith.constant 3 : i32
      %c0_i32_83 = arith.constant 0 : i32
      %138 = tpu.memref_slice %arg5[%39, %c0_i32_83] : memref<48x32xf32, #tpu.memory_space<any>> -> memref<1x32xf32, #tpu.memory_space<any>>
      %c3_i32_84 = arith.constant 3 : i32
      %c0_i32_85 = arith.constant 0 : i32
      %139 = tpu.memref_slice %arg7[%c3_i32_84, %c0_i32_85] : memref<8x32xf32, #tpu.memory_space<vmem>> -> memref<1x32xf32, #tpu.memory_space<vmem>>
      %140 = tpu.memref_slice %arg8[%c3_i32_82] : memref<8x!tpu.dma_semaphore, #tpu.memory_space<semaphore_mem>> -> memref<1x!tpu.dma_semaphore, #tpu.memory_space<semaphore_mem>>
      %141 = tpu.memref_squeeze %140 : memref<1x!tpu.dma_semaphore, #tpu.memory_space<semaphore_mem>> -> memref<!tpu.dma_semaphore, #tpu.memory_space<semaphore_mem>>
      tpu.enqueue_dma source(%138 : memref<1x32xf32, #tpu.memory_space<any>>) target(%139 : memref<1x32xf32, #tpu.memory_space<vmem>>) target_semaphore(%141 : memref<!tpu.dma_semaphore, #tpu.memory_space<semaphore_mem>>)
    } else {
    }
    %c4_i32 = arith.constant 4 : i32
    %48 = arith.addi %0, %c4_i32 : i32
    %49 = arith.index_cast %48 : i32 to index
    %50 = memref.load %arg1[%49] : memref<8xi32, #tpu.memory_space<smem>>
    %51 = arith.index_cast %48 : i32 to index
    %52 = memref.load %arg2[%51] : memref<8xi32, #tpu.memory_space<smem>>
    %c0_i32_18 = arith.constant 0 : i32
    %53 = arith.cmpi eq, %52, %c0_i32_18 : i32
    %54 = arith.extui %53 : i1 to i32
    %c0_i32_19 = arith.constant 0 : i32
    %55 = arith.cmpi ne, %54, %c0_i32_19 : i32
    scf.if %55 {
      %c4_i32_82 = arith.constant 4 : i32
      %c0_i32_83 = arith.constant 0 : i32
      %138 = tpu.memref_slice %arg4[%50, %c0_i32_83] : memref<32x32xf32, #tpu.memory_space<any>> -> memref<1x32xf32, #tpu.memory_space<any>>
      %c4_i32_84 = arith.constant 4 : i32
      %c0_i32_85 = arith.constant 0 : i32
      %139 = tpu.memref_slice %arg7[%c4_i32_84, %c0_i32_85] : memref<8x32xf32, #tpu.memory_space<vmem>> -> memref<1x32xf32, #tpu.memory_space<vmem>>
      %140 = tpu.memref_slice %arg8[%c4_i32_82] : memref<8x!tpu.dma_semaphore, #tpu.memory_space<semaphore_mem>> -> memref<1x!tpu.dma_semaphore, #tpu.memory_space<semaphore_mem>>
      %141 = tpu.memref_squeeze %140 : memref<1x!tpu.dma_semaphore, #tpu.memory_space<semaphore_mem>> -> memref<!tpu.dma_semaphore, #tpu.memory_space<semaphore_mem>>
      tpu.enqueue_dma source(%138 : memref<1x32xf32, #tpu.memory_space<any>>) target(%139 : memref<1x32xf32, #tpu.memory_space<vmem>>) target_semaphore(%141 : memref<!tpu.dma_semaphore, #tpu.memory_space<semaphore_mem>>)
    } else {
    }
    %c1_i32_20 = arith.constant 1 : i32
    %56 = arith.cmpi eq, %52, %c1_i32_20 : i32
    %57 = arith.extui %56 : i1 to i32
    %c0_i32_21 = arith.constant 0 : i32
    %58 = arith.cmpi ne, %57, %c0_i32_21 : i32
    scf.if %58 {
      %c4_i32_82 = arith.constant 4 : i32
      %c0_i32_83 = arith.constant 0 : i32
      %138 = tpu.memref_slice %arg5[%50, %c0_i32_83] : memref<48x32xf32, #tpu.memory_space<any>> -> memref<1x32xf32, #tpu.memory_space<any>>
      %c4_i32_84 = arith.constant 4 : i32
      %c0_i32_85 = arith.constant 0 : i32
      %139 = tpu.memref_slice %arg7[%c4_i32_84, %c0_i32_85] : memref<8x32xf32, #tpu.memory_space<vmem>> -> memref<1x32xf32, #tpu.memory_space<vmem>>
      %140 = tpu.memref_slice %arg8[%c4_i32_82] : memref<8x!tpu.dma_semaphore, #tpu.memory_space<semaphore_mem>> -> memref<1x!tpu.dma_semaphore, #tpu.memory_space<semaphore_mem>>
      %141 = tpu.memref_squeeze %140 : memref<1x!tpu.dma_semaphore, #tpu.memory_space<semaphore_mem>> -> memref<!tpu.dma_semaphore, #tpu.memory_space<semaphore_mem>>
      tpu.enqueue_dma source(%138 : memref<1x32xf32, #tpu.memory_space<any>>) target(%139 : memref<1x32xf32, #tpu.memory_space<vmem>>) target_semaphore(%141 : memref<!tpu.dma_semaphore, #tpu.memory_space<semaphore_mem>>)
    } else {
    }
    %c5_i32 = arith.constant 5 : i32
    %59 = arith.addi %0, %c5_i32 : i32
    %60 = arith.index_cast %59 : i32 to index
    %61 = memref.load %arg1[%60] : memref<8xi32, #tpu.memory_space<smem>>
    %62 = arith.index_cast %59 : i32 to index
    %63 = memref.load %arg2[%62] : memref<8xi32, #tpu.memory_space<smem>>
    %c0_i32_22 = arith.constant 0 : i32
    %64 = arith.cmpi eq, %63, %c0_i32_22 : i32
    %65 = arith.extui %64 : i1 to i32
    %c0_i32_23 = arith.constant 0 : i32
    %66 = arith.cmpi ne, %65, %c0_i32_23 : i32
    scf.if %66 {
      %c5_i32_82 = arith.constant 5 : i32
      %c0_i32_83 = arith.constant 0 : i32
      %138 = tpu.memref_slice %arg4[%61, %c0_i32_83] : memref<32x32xf32, #tpu.memory_space<any>> -> memref<1x32xf32, #tpu.memory_space<any>>
      %c5_i32_84 = arith.constant 5 : i32
      %c0_i32_85 = arith.constant 0 : i32
      %139 = tpu.memref_slice %arg7[%c5_i32_84, %c0_i32_85] : memref<8x32xf32, #tpu.memory_space<vmem>> -> memref<1x32xf32, #tpu.memory_space<vmem>>
      %140 = tpu.memref_slice %arg8[%c5_i32_82] : memref<8x!tpu.dma_semaphore, #tpu.memory_space<semaphore_mem>> -> memref<1x!tpu.dma_semaphore, #tpu.memory_space<semaphore_mem>>
      %141 = tpu.memref_squeeze %140 : memref<1x!tpu.dma_semaphore, #tpu.memory_space<semaphore_mem>> -> memref<!tpu.dma_semaphore, #tpu.memory_space<semaphore_mem>>
      tpu.enqueue_dma source(%138 : memref<1x32xf32, #tpu.memory_space<any>>) target(%139 : memref<1x32xf32, #tpu.memory_space<vmem>>) target_semaphore(%141 : memref<!tpu.dma_semaphore, #tpu.memory_space<semaphore_mem>>)
    } else {
    }
    %c1_i32_24 = arith.constant 1 : i32
    %67 = arith.cmpi eq, %63, %c1_i32_24 : i32
    %68 = arith.extui %67 : i1 to i32
    %c0_i32_25 = arith.constant 0 : i32
    %69 = arith.cmpi ne, %68, %c0_i32_25 : i32
    scf.if %69 {
      %c5_i32_82 = arith.constant 5 : i32
      %c0_i32_83 = arith.constant 0 : i32
      %138 = tpu.memref_slice %arg5[%61, %c0_i32_83] : memref<48x32xf32, #tpu.memory_space<any>> -> memref<1x32xf32, #tpu.memory_space<any>>
      %c5_i32_84 = arith.constant 5 : i32
      %c0_i32_85 = arith.constant 0 : i32
      %139 = tpu.memref_slice %arg7[%c5_i32_84, %c0_i32_85] : memref<8x32xf32, #tpu.memory_space<vmem>> -> memref<1x32xf32, #tpu.memory_space<vmem>>
      %140 = tpu.memref_slice %arg8[%c5_i32_82] : memref<8x!tpu.dma_semaphore, #tpu.memory_space<semaphore_mem>> -> memref<1x!tpu.dma_semaphore, #tpu.memory_space<semaphore_mem>>
      %141 = tpu.memref_squeeze %140 : memref<1x!tpu.dma_semaphore, #tpu.memory_space<semaphore_mem>> -> memref<!tpu.dma_semaphore, #tpu.memory_space<semaphore_mem>>
      tpu.enqueue_dma source(%138 : memref<1x32xf32, #tpu.memory_space<any>>) target(%139 : memref<1x32xf32, #tpu.memory_space<vmem>>) target_semaphore(%141 : memref<!tpu.dma_semaphore, #tpu.memory_space<semaphore_mem>>)
    } else {
    }
    %c6_i32 = arith.constant 6 : i32
    %70 = arith.addi %0, %c6_i32 : i32
    %71 = arith.index_cast %70 : i32 to index
    %72 = memref.load %arg1[%71] : memref<8xi32, #tpu.memory_space<smem>>
    %73 = arith.index_cast %70 : i32 to index
    %74 = memref.load %arg2[%73] : memref<8xi32, #tpu.memory_space<smem>>
    %c0_i32_26 = arith.constant 0 : i32
    %75 = arith.cmpi eq, %74, %c0_i32_26 : i32
    %76 = arith.extui %75 : i1 to i32
    %c0_i32_27 = arith.constant 0 : i32
    %77 = arith.cmpi ne, %76, %c0_i32_27 : i32
    scf.if %77 {
      %c6_i32_82 = arith.constant 6 : i32
      %c0_i32_83 = arith.constant 0 : i32
      %138 = tpu.memref_slice %arg4[%72, %c0_i32_83] : memref<32x32xf32, #tpu.memory_space<any>> -> memref<1x32xf32, #tpu.memory_space<any>>
      %c6_i32_84 = arith.constant 6 : i32
      %c0_i32_85 = arith.constant 0 : i32
      %139 = tpu.memref_slice %arg7[%c6_i32_84, %c0_i32_85] : memref<8x32xf32, #tpu.memory_space<vmem>> -> memref<1x32xf32, #tpu.memory_space<vmem>>
      %140 = tpu.memref_slice %arg8[%c6_i32_82] : memref<8x!tpu.dma_semaphore, #tpu.memory_space<semaphore_mem>> -> memref<1x!tpu.dma_semaphore, #tpu.memory_space<semaphore_mem>>
      %141 = tpu.memref_squeeze %140 : memref<1x!tpu.dma_semaphore, #tpu.memory_space<semaphore_mem>> -> memref<!tpu.dma_semaphore, #tpu.memory_space<semaphore_mem>>
      tpu.enqueue_dma source(%138 : memref<1x32xf32, #tpu.memory_space<any>>) target(%139 : memref<1x32xf32, #tpu.memory_space<vmem>>) target_semaphore(%141 : memref<!tpu.dma_semaphore, #tpu.memory_space<semaphore_mem>>)
    } else {
    }
    %c1_i32_28 = arith.constant 1 : i32
    %78 = arith.cmpi eq, %74, %c1_i32_28 : i32
    %79 = arith.extui %78 : i1 to i32
    %c0_i32_29 = arith.constant 0 : i32
    %80 = arith.cmpi ne, %79, %c0_i32_29 : i32
    scf.if %80 {
      %c6_i32_82 = arith.constant 6 : i32
      %c0_i32_83 = arith.constant 0 : i32
      %138 = tpu.memref_slice %arg5[%72, %c0_i32_83] : memref<48x32xf32, #tpu.memory_space<any>> -> memref<1x32xf32, #tpu.memory_space<any>>
      %c6_i32_84 = arith.constant 6 : i32
      %c0_i32_85 = arith.constant 0 : i32
      %139 = tpu.memref_slice %arg7[%c6_i32_84, %c0_i32_85] : memref<8x32xf32, #tpu.memory_space<vmem>> -> memref<1x32xf32, #tpu.memory_space<vmem>>
      %140 = tpu.memref_slice %arg8[%c6_i32_82] : memref<8x!tpu.dma_semaphore, #tpu.memory_space<semaphore_mem>> -> memref<1x!tpu.dma_semaphore, #tpu.memory_space<semaphore_mem>>
      %141 = tpu.memref_squeeze %140 : memref<1x!tpu.dma_semaphore, #tpu.memory_space<semaphore_mem>> -> memref<!tpu.dma_semaphore, #tpu.memory_space<semaphore_mem>>
      tpu.enqueue_dma source(%138 : memref<1x32xf32, #tpu.memory_space<any>>) target(%139 : memref<1x32xf32, #tpu.memory_space<vmem>>) target_semaphore(%141 : memref<!tpu.dma_semaphore, #tpu.memory_space<semaphore_mem>>)
    } else {
    }
    %c7_i32 = arith.constant 7 : i32
    %81 = arith.addi %0, %c7_i32 : i32
    %82 = arith.index_cast %81 : i32 to index
    %83 = memref.load %arg1[%82] : memref<8xi32, #tpu.memory_space<smem>>
    %84 = arith.index_cast %81 : i32 to index
    %85 = memref.load %arg2[%84] : memref<8xi32, #tpu.memory_space<smem>>
    %c0_i32_30 = arith.constant 0 : i32
    %86 = arith.cmpi eq, %85, %c0_i32_30 : i32
    %87 = arith.extui %86 : i1 to i32
    %c0_i32_31 = arith.constant 0 : i32
    %88 = arith.cmpi ne, %87, %c0_i32_31 : i32
    scf.if %88 {
      %c7_i32_82 = arith.constant 7 : i32
      %c0_i32_83 = arith.constant 0 : i32
      %138 = tpu.memref_slice %arg4[%83, %c0_i32_83] : memref<32x32xf32, #tpu.memory_space<any>> -> memref<1x32xf32, #tpu.memory_space<any>>
      %c7_i32_84 = arith.constant 7 : i32
      %c0_i32_85 = arith.constant 0 : i32
      %139 = tpu.memref_slice %arg7[%c7_i32_84, %c0_i32_85] : memref<8x32xf32, #tpu.memory_space<vmem>> -> memref<1x32xf32, #tpu.memory_space<vmem>>
      %140 = tpu.memref_slice %arg8[%c7_i32_82] : memref<8x!tpu.dma_semaphore, #tpu.memory_space<semaphore_mem>> -> memref<1x!tpu.dma_semaphore, #tpu.memory_space<semaphore_mem>>
      %141 = tpu.memref_squeeze %140 : memref<1x!tpu.dma_semaphore, #tpu.memory_space<semaphore_mem>> -> memref<!tpu.dma_semaphore, #tpu.memory_space<semaphore_mem>>
      tpu.enqueue_dma source(%138 : memref<1x32xf32, #tpu.memory_space<any>>) target(%139 : memref<1x32xf32, #tpu.memory_space<vmem>>) target_semaphore(%141 : memref<!tpu.dma_semaphore, #tpu.memory_space<semaphore_mem>>)
    } else {
    }
    %c1_i32_32 = arith.constant 1 : i32
    %89 = arith.cmpi eq, %85, %c1_i32_32 : i32
    %90 = arith.extui %89 : i1 to i32
    %c0_i32_33 = arith.constant 0 : i32
    %91 = arith.cmpi ne, %90, %c0_i32_33 : i32
    scf.if %91 {
      %c7_i32_82 = arith.constant 7 : i32
      %c0_i32_83 = arith.constant 0 : i32
      %138 = tpu.memref_slice %arg5[%83, %c0_i32_83] : memref<48x32xf32, #tpu.memory_space<any>> -> memref<1x32xf32, #tpu.memory_space<any>>
      %c7_i32_84 = arith.constant 7 : i32
      %c0_i32_85 = arith.constant 0 : i32
      %139 = tpu.memref_slice %arg7[%c7_i32_84, %c0_i32_85] : memref<8x32xf32, #tpu.memory_space<vmem>> -> memref<1x32xf32, #tpu.memory_space<vmem>>
      %140 = tpu.memref_slice %arg8[%c7_i32_82] : memref<8x!tpu.dma_semaphore, #tpu.memory_space<semaphore_mem>> -> memref<1x!tpu.dma_semaphore, #tpu.memory_space<semaphore_mem>>
      %141 = tpu.memref_squeeze %140 : memref<1x!tpu.dma_semaphore, #tpu.memory_space<semaphore_mem>> -> memref<!tpu.dma_semaphore, #tpu.memory_space<semaphore_mem>>
      tpu.enqueue_dma source(%138 : memref<1x32xf32, #tpu.memory_space<any>>) target(%139 : memref<1x32xf32, #tpu.memory_space<vmem>>) target_semaphore(%141 : memref<!tpu.dma_semaphore, #tpu.memory_space<semaphore_mem>>)
    } else {
    }
    %c0_i32_34 = arith.constant 0 : i32
    %c0_i32_35 = arith.constant 0 : i32
    %c0_i32_36 = arith.constant 0 : i32
    %92 = tpu.memref_slice %arg4[%c0_i32_35, %c0_i32_36] : memref<32x32xf32, #tpu.memory_space<any>> -> memref<1x32xf32, #tpu.memory_space<any>>
    %c0_i32_37 = arith.constant 0 : i32
    %c0_i32_38 = arith.constant 0 : i32
    %93 = tpu.memref_slice %arg7[%c0_i32_37, %c0_i32_38] : memref<8x32xf32, #tpu.memory_space<vmem>> -> memref<1x32xf32, #tpu.memory_space<vmem>>
    %94 = tpu.memref_slice %arg8[%c0_i32_34] : memref<8x!tpu.dma_semaphore, #tpu.memory_space<semaphore_mem>> -> memref<1x!tpu.dma_semaphore, #tpu.memory_space<semaphore_mem>>
    %95 = tpu.memref_squeeze %94 : memref<1x!tpu.dma_semaphore, #tpu.memory_space<semaphore_mem>> -> memref<!tpu.dma_semaphore, #tpu.memory_space<semaphore_mem>>
    tpu.wait_dma2 semaphore(%95 : memref<!tpu.dma_semaphore, #tpu.memory_space<semaphore_mem>>) src(%92 : memref<1x32xf32, #tpu.memory_space<any>>) dst(%93 : memref<1x32xf32, #tpu.memory_space<vmem>>)
    %c1_i32_39 = arith.constant 1 : i32
    %c0_i32_40 = arith.constant 0 : i32
    %c0_i32_41 = arith.constant 0 : i32
    %96 = tpu.memref_slice %arg4[%c0_i32_40, %c0_i32_41] : memref<32x32xf32, #tpu.memory_space<any>> -> memref<1x32xf32, #tpu.memory_space<any>>
    %c1_i32_42 = arith.constant 1 : i32
    %c0_i32_43 = arith.constant 0 : i32
    %97 = tpu.memref_slice %arg7[%c1_i32_42, %c0_i32_43] : memref<8x32xf32, #tpu.memory_space<vmem>> -> memref<1x32xf32, #tpu.memory_space<vmem>>
    %98 = tpu.memref_slice %arg8[%c1_i32_39] : memref<8x!tpu.dma_semaphore, #tpu.memory_space<semaphore_mem>> -> memref<1x!tpu.dma_semaphore, #tpu.memory_space<semaphore_mem>>
    %99 = tpu.memref_squeeze %98 : memref<1x!tpu.dma_semaphore, #tpu.memory_space<semaphore_mem>> -> memref<!tpu.dma_semaphore, #tpu.memory_space<semaphore_mem>>
    tpu.wait_dma2 semaphore(%99 : memref<!tpu.dma_semaphore, #tpu.memory_space<semaphore_mem>>) src(%96 : memref<1x32xf32, #tpu.memory_space<any>>) dst(%97 : memref<1x32xf32, #tpu.memory_space<vmem>>)
    %c2_i32_44 = arith.constant 2 : i32
    %c0_i32_45 = arith.constant 0 : i32
    %c0_i32_46 = arith.constant 0 : i32
    %100 = tpu.memref_slice %arg4[%c0_i32_45, %c0_i32_46] : memref<32x32xf32, #tpu.memory_space<any>> -> memref<1x32xf32, #tpu.memory_space<any>>
    %c2_i32_47 = arith.constant 2 : i32
    %c0_i32_48 = arith.constant 0 : i32
    %101 = tpu.memref_slice %arg7[%c2_i32_47, %c0_i32_48] : memref<8x32xf32, #tpu.memory_space<vmem>> -> memref<1x32xf32, #tpu.memory_space<vmem>>
    %102 = tpu.memref_slice %arg8[%c2_i32_44] : memref<8x!tpu.dma_semaphore, #tpu.memory_space<semaphore_mem>> -> memref<1x!tpu.dma_semaphore, #tpu.memory_space<semaphore_mem>>
    %103 = tpu.memref_squeeze %102 : memref<1x!tpu.dma_semaphore, #tpu.memory_space<semaphore_mem>> -> memref<!tpu.dma_semaphore, #tpu.memory_space<semaphore_mem>>
    tpu.wait_dma2 semaphore(%103 : memref<!tpu.dma_semaphore, #tpu.memory_space<semaphore_mem>>) src(%100 : memref<1x32xf32, #tpu.memory_space<any>>) dst(%101 : memref<1x32xf32, #tpu.memory_space<vmem>>)
    %c3_i32_49 = arith.constant 3 : i32
    %c0_i32_50 = arith.constant 0 : i32
    %c0_i32_51 = arith.constant 0 : i32
    %104 = tpu.memref_slice %arg4[%c0_i32_50, %c0_i32_51] : memref<32x32xf32, #tpu.memory_space<any>> -> memref<1x32xf32, #tpu.memory_space<any>>
    %c3_i32_52 = arith.constant 3 : i32
    %c0_i32_53 = arith.constant 0 : i32
    %105 = tpu.memref_slice %arg7[%c3_i32_52, %c0_i32_53] : memref<8x32xf32, #tpu.memory_space<vmem>> -> memref<1x32xf32, #tpu.memory_space<vmem>>
    %106 = tpu.memref_slice %arg8[%c3_i32_49] : memref<8x!tpu.dma_semaphore, #tpu.memory_space<semaphore_mem>> -> memref<1x!tpu.dma_semaphore, #tpu.memory_space<semaphore_mem>>
    %107 = tpu.memref_squeeze %106 : memref<1x!tpu.dma_semaphore, #tpu.memory_space<semaphore_mem>> -> memref<!tpu.dma_semaphore, #tpu.memory_space<semaphore_mem>>
    tpu.wait_dma2 semaphore(%107 : memref<!tpu.dma_semaphore, #tpu.memory_space<semaphore_mem>>) src(%104 : memref<1x32xf32, #tpu.memory_space<any>>) dst(%105 : memref<1x32xf32, #tpu.memory_space<vmem>>)
    %c4_i32_54 = arith.constant 4 : i32
    %c0_i32_55 = arith.constant 0 : i32
    %c0_i32_56 = arith.constant 0 : i32
    %108 = tpu.memref_slice %arg4[%c0_i32_55, %c0_i32_56] : memref<32x32xf32, #tpu.memory_space<any>> -> memref<1x32xf32, #tpu.memory_space<any>>
    %c4_i32_57 = arith.constant 4 : i32
    %c0_i32_58 = arith.constant 0 : i32
    %109 = tpu.memref_slice %arg7[%c4_i32_57, %c0_i32_58] : memref<8x32xf32, #tpu.memory_space<vmem>> -> memref<1x32xf32, #tpu.memory_space<vmem>>
    %110 = tpu.memref_slice %arg8[%c4_i32_54] : memref<8x!tpu.dma_semaphore, #tpu.memory_space<semaphore_mem>> -> memref<1x!tpu.dma_semaphore, #tpu.memory_space<semaphore_mem>>
    %111 = tpu.memref_squeeze %110 : memref<1x!tpu.dma_semaphore, #tpu.memory_space<semaphore_mem>> -> memref<!tpu.dma_semaphore, #tpu.memory_space<semaphore_mem>>
    tpu.wait_dma2 semaphore(%111 : memref<!tpu.dma_semaphore, #tpu.memory_space<semaphore_mem>>) src(%108 : memref<1x32xf32, #tpu.memory_space<any>>) dst(%109 : memref<1x32xf32, #tpu.memory_space<vmem>>)
    %c5_i32_59 = arith.constant 5 : i32
    %c0_i32_60 = arith.constant 0 : i32
    %c0_i32_61 = arith.constant 0 : i32
    %112 = tpu.memref_slice %arg4[%c0_i32_60, %c0_i32_61] : memref<32x32xf32, #tpu.memory_space<any>> -> memref<1x32xf32, #tpu.memory_space<any>>
    %c5_i32_62 = arith.constant 5 : i32
    %c0_i32_63 = arith.constant 0 : i32
    %113 = tpu.memref_slice %arg7[%c5_i32_62, %c0_i32_63] : memref<8x32xf32, #tpu.memory_space<vmem>> -> memref<1x32xf32, #tpu.memory_space<vmem>>
    %114 = tpu.memref_slice %arg8[%c5_i32_59] : memref<8x!tpu.dma_semaphore, #tpu.memory_space<semaphore_mem>> -> memref<1x!tpu.dma_semaphore, #tpu.memory_space<semaphore_mem>>
    %115 = tpu.memref_squeeze %114 : memref<1x!tpu.dma_semaphore, #tpu.memory_space<semaphore_mem>> -> memref<!tpu.dma_semaphore, #tpu.memory_space<semaphore_mem>>
    tpu.wait_dma2 semaphore(%115 : memref<!tpu.dma_semaphore, #tpu.memory_space<semaphore_mem>>) src(%112 : memref<1x32xf32, #tpu.memory_space<any>>) dst(%113 : memref<1x32xf32, #tpu.memory_space<vmem>>)
    %c6_i32_64 = arith.constant 6 : i32
    %c0_i32_65 = arith.constant 0 : i32
    %c0_i32_66 = arith.constant 0 : i32
    %116 = tpu.memref_slice %arg4[%c0_i32_65, %c0_i32_66] : memref<32x32xf32, #tpu.memory_space<any>> -> memref<1x32xf32, #tpu.memory_space<any>>
    %c6_i32_67 = arith.constant 6 : i32
    %c0_i32_68 = arith.constant 0 : i32
    %117 = tpu.memref_slice %arg7[%c6_i32_67, %c0_i32_68] : memref<8x32xf32, #tpu.memory_space<vmem>> -> memref<1x32xf32, #tpu.memory_space<vmem>>
    %118 = tpu.memref_slice %arg8[%c6_i32_64] : memref<8x!tpu.dma_semaphore, #tpu.memory_space<semaphore_mem>> -> memref<1x!tpu.dma_semaphore, #tpu.memory_space<semaphore_mem>>
    %119 = tpu.memref_squeeze %118 : memref<1x!tpu.dma_semaphore, #tpu.memory_space<semaphore_mem>> -> memref<!tpu.dma_semaphore, #tpu.memory_space<semaphore_mem>>
    tpu.wait_dma2 semaphore(%119 : memref<!tpu.dma_semaphore, #tpu.memory_space<semaphore_mem>>) src(%116 : memref<1x32xf32, #tpu.memory_space<any>>) dst(%117 : memref<1x32xf32, #tpu.memory_space<vmem>>)
    %c7_i32_69 = arith.constant 7 : i32
    %c0_i32_70 = arith.constant 0 : i32
    %c0_i32_71 = arith.constant 0 : i32
    %120 = tpu.memref_slice %arg4[%c0_i32_70, %c0_i32_71] : memref<32x32xf32, #tpu.memory_space<any>> -> memref<1x32xf32, #tpu.memory_space<any>>
    %c7_i32_72 = arith.constant 7 : i32
    %c0_i32_73 = arith.constant 0 : i32
    %121 = tpu.memref_slice %arg7[%c7_i32_72, %c0_i32_73] : memref<8x32xf32, #tpu.memory_space<vmem>> -> memref<1x32xf32, #tpu.memory_space<vmem>>
    %122 = tpu.memref_slice %arg8[%c7_i32_69] : memref<8x!tpu.dma_semaphore, #tpu.memory_space<semaphore_mem>> -> memref<1x!tpu.dma_semaphore, #tpu.memory_space<semaphore_mem>>
    %123 = tpu.memref_squeeze %122 : memref<1x!tpu.dma_semaphore, #tpu.memory_space<semaphore_mem>> -> memref<!tpu.dma_semaphore, #tpu.memory_space<semaphore_mem>>
    tpu.wait_dma2 semaphore(%123 : memref<!tpu.dma_semaphore, #tpu.memory_space<semaphore_mem>>) src(%120 : memref<1x32xf32, #tpu.memory_space<any>>) dst(%121 : memref<1x32xf32, #tpu.memory_space<vmem>>)
    %c0 = arith.constant 0 : index
    %c0_74 = arith.constant 0 : index
    %124 = vector.load %arg3[%c0, %c0_74] : memref<8x32xf32, #tpu.memory_space<vmem>>, vector<8x32xf32>
    %c0_75 = arith.constant 0 : index
    %c0_76 = arith.constant 0 : index
    %125 = vector.load %arg7[%c0_75, %c0_76] : memref<8x32xf32, #tpu.memory_space<vmem>>, vector<8x32xf32>
    %126 = arith.subf %124, %125 : vector<8x32xf32>
    %127 = arith.mulf %126, %126 : vector<8x32xf32>
    %128 = tpu.iota {dimensions = array<i32: 0>} : vector<8x32xi32>
    %129 = vector.broadcast %0 : i32 to vector<8x32xi32>
    %130 = arith.addi %128, %129 : vector<8x32xi32>
    %c4_i32_77 = arith.constant 4 : i32
    %131 = vector.broadcast %c4_i32_77 : i32 to vector<8x32xi32>
    %132 = arith.cmpi slt, %130, %131 : vector<8x32xi32>
    %cst = arith.constant 0.000000e+00 : f32
    %133 = vector.broadcast %cst : f32 to vector<8x32xf32>
    %134 = arith.select %132, %127, %133 : vector<8x32xi1>, vector<8x32xf32>
    %c0_78 = arith.constant 0 : index
    %c0_79 = arith.constant 0 : index
    %135 = vector.load %arg6[%c0_78, %c0_79] : memref<8x32xf32, #tpu.memory_space<vmem>>, vector<8x32xf32>
    %136 = arith.addf %135, %134 : vector<8x32xf32>
    %c0_80 = arith.constant 0 : index
    %c0_81 = arith.constant 0 : index
    %137 = vector.load %arg6[%c0_80, %c0_81] : memref<8x32xf32, #tpu.memory_space<vmem>>, vector<8x32xf32>
    tpu.vector_store %arg6[%c0_80, %c0_81], %136 {strides = array<i32>} : memref<8x32xf32, #tpu.memory_space<vmem>>, vector<8x32xf32>,
    return
  }
  func.func @transform_0(%arg0: i32, %arg1: memref<8xi32, #tpu.memory_space<smem>>, %arg2: memref<8xi32, #tpu.memory_space<smem>>) -> (i32, i32) {
    %c0_i32 = arith.constant 0 : i32
    %c0_i32_0 = arith.constant 0 : i32
    return %arg0, %c0_i32 : i32, i32
  }
  func.func @transform_3(%arg0: i32, %arg1: memref<8xi32, #tpu.memory_space<smem>>, %arg2: memref<8xi32, #tpu.memory_space<smem>>) -> (i32, i32) {
    %c0_i32 = arith.constant 0 : i32
    %c0_i32_0 = arith.constant 0 : i32
    %c0_i32_1 = arith.constant 0 : i32
    return %c0_i32, %c0_i32_0 : i32, i32
  }
}

</mosaic_0001>

<bundles_post_ra>
// kernel: tpu_custom_call.1
= control target key start
LH: loop header
LB: loop body
LE: loop exit
PB: predicated region body
PF: predicated region fallthrough
CT: control target
= control target key end

     0   :  { %s1375_s0 = inlined_call_operand.vmem [shape: s32[8], index: 0, kind: input, shape index: {}]   ;;  %s1376_s2 = inlined_call_operand.vmem [shape: f32[8,32], index: 2, kind: input, shape index: {}]   ;;  %s1377_s3 = inlined_call_operand.vmem [shape: f32[32,32], index: 3, kind: input, shape index: {}]   ;;  %s1378_s4 = inlined_call_operand.vmem [shape: f32[48,32], index: 4, kind: input, shape index: {}]   ;;  %s1379_s5 = inlined_call_operand.hbm [shape: f32[8,32], index: 5, kind: output, shape index: {}]   ;;  %s1380_s1 = inlined_call_operand.vmem [shape: s32[8], index: 1, kind: input, shape index: {}]  }
   0x1   :  { %s10_s20 = sshll.u32 %s1375_s0, 4  ;;  %s14_s23 = sshll.u32 %s1380_s1, 4  ;;  %s11_s20 = int_to_ptr.vmem [resolvable:$true] %s10_s20  ;;  %s15_s23 = int_to_ptr.vmem [resolvable:$true] %s14_s23 }
   0x2   :  { %s1204_s24 = scalar_lea.vmem %s11_s20, 16  ;;  %p1209_p1 = scmp.lt.s32.totalorder %s11_s20, %s11_s20 }
   0x3   :  { %p1205_p0 = scmp.ne.s32.totalorder %s11_s20, %s1204_s24  ;;  %p1210_p2 = scmp.lt.s32.totalorder %s1204_s24, %s1204_s24 }
   0x5   :  { %p1211_p3 = por %p1210_p2, %p1209_p1 }
   0x7   :  { %p1212_p4 = pnand %p1211_p3, %p1205_p0 }
   0x9   :  { %1215 = shalt.err (!%p1212_p4)  }
   0xa   :  { %s1270_s25 = smov [#allocation5]   ;;  %s1216_s26 = scalar_lea.vmem %s15_s23, 16 }
   0xb   :  { %13 = dma.vmem_to_smem %s11_s20, 16, %s1270_s25, [#allocation4] }
   0xc   :  { %p1217_p5 = scmp.ne.s32.totalorder %s15_s23, %s1216_s26  ;;  %p1221_p6 = scmp.lt.s32.totalorder %s15_s23, %s15_s23 }
   0xd   :  { %p1222_p7 = scmp.lt.s32.totalorder %s1216_s26, %s1216_s26 }
   0xf   :  { %p1223_p8 = por %p1222_p7, %p1221_p6 }
  0x11   :  { %p1224_p9 = pnand %p1223_p8, %p1217_p5 }
  0x13   :  { %1227 = shalt.err (!%p1224_p9)  }
  0x14   :  { %s1271_s0 = smov [#allocation6]  }
  0x15   :  { %17 = dma.vmem_to_smem %s15_s23, 16, %s1271_s0, [#allocation4] }
  0x16   :  { %1250 = dma.done.wait [#allocation4], 32 }
  0x17   :  { %1251 = vsyncadd [#allocation4], 4294967264 }
  0x18   :  { %19 = sfence }
  0x19   :  { %20 = vsyncpa [#allocation8], 0  ;;  %vm28_vm0 = vcmask 261120   ;;  %s30_s1 = sld [smem:[#allocation5]]  ;;  %v1272_v0 = vmov 0.0  }
  0x1a   :  { %29 = vst.msk [vmem:[#allocation7] sm:$0xff] %vm28_vm0, %v1272_v0  ;;  %s31_s27 = sld [smem:[#allocation6]] }
  0x20   :  { %p1162_p10 = scmp.ne.s32.totalorder %s31_s27, 0 }
  0x21   :  { %s36_s30 = scalar_lea.vmem (!%p1162_p10), %s1377_s3, %s30_s1 }
  0x22   :  { %35 = sbr.rel (%p1162_p10) target bundleno = 42 (0x2a), region = 13  ;;  %v54_v1 = vld [vmem:[%s36_s30] sm:$0x1] (!%p1162_p10) }
  0x23   :  { %55 = vst [vmem:[#allocation2] sm:$0x1] (!%p1162_p10), %v54_v1 }
  0x29   :  { %80 = vsyncadd [#allocation3], 16 }
  0x2a PF:  { %p1163_p11 = scmp.ne.s32.totalorder %s31_s27, 1 }
  0x2b   :  { %s85_s8 = scalar_lea.vmem (!%p1163_p11), %s1378_s4, %s30_s1 }
  0x2c   :  { %84 = sbr.rel (%p1163_p11) target bundleno = 52 (0x34), region = 47  ;;  %v103_v2 = vld [vmem:[%s85_s8] sm:$0x1] (!%p1163_p11) }
  0x2d   :  { %104 = vst [vmem:[#allocation2] sm:$0x1] (!%p1163_p11), %v103_v2 }
  0x33   :  { %129 = vsyncadd [#allocation3], 16 }
  0x34 PF:  { %s1164_s9 = sld [smem:[#allocation5 + $0x1]] }
  0x35   :  { %s1165_s10 = sld [smem:[#allocation6 + $0x1]] }
  0x3b   :  { %p1166_p12 = scmp.ne.s32.totalorder %s1165_s10, 0 }
  0x3c   :  { %s137_s13 = scalar_lea.vmem (!%p1166_p12), %s1377_s3, %s1164_s9 }
  0x3d   :  { %136 = sbr.rel (%p1166_p12) target bundleno = 69 (0x45), region = 81  ;;  %v157_v3 = vld [vmem:[%s137_s13] sm:$0x1] (!%p1166_p12) }
  0x3e   :  { %158 = vst [vmem:[#allocation2 + $0x1] sm:$0x1] (!%p1166_p12), %v157_v3 }
  0x44   :  { %183 = vsyncadd [#allocation3 + $0x1], 16 }
  0x45 PF:  { %p1167_p13 = scmp.ne.s32.totalorder %s1165_s10, 1 }
  0x46   :  { %s188_s16 = scalar_lea.vmem (!%p1167_p13), %s1378_s4, %s1164_s9 }
  0x47   :  { %187 = sbr.rel (%p1167_p13) target bundleno = 79 (0x4f), region = 115  ;;  %v208_v4 = vld [vmem:[%s188_s16] sm:$0x1] (!%p1167_p13) }
  0x48   :  { %209 = vst [vmem:[#allocation2 + $0x1] sm:$0x1] (!%p1167_p13), %v208_v4 }
  0x4e   :  { %234 = vsyncadd [#allocation3 + $0x1], 16 }
  0x4f PF:  { %s1168_s17 = sld [smem:[#allocation5 + $0x2]] }
  0x50   :  { %s1169_s18 = sld [smem:[#allocation6 + $0x2]] }
  0x56   :  { %p1170_p0 = scmp.ne.s32.totalorder %s1169_s18, 0 }
  0x57   :  { %s242_s21 = scalar_lea.vmem (!%p1170_p0), %s1377_s3, %s1168_s17 }
  0x58   :  { %241 = sbr.rel (%p1170_p0) target bundleno = 96 (0x60), region = 149  ;;  %v262_v5 = vld [vmem:[%s242_s21] sm:$0x1] (!%p1170_p0) }
  0x59   :  { %263 = vst [vmem:[#allocation2 + $0x2] sm:$0x1] (!%p1170_p0), %v262_v5 }
  0x5f   :  { %288 = vsyncadd [#allocation3 + $0x2], 16 }
  0x60 PF:  { %p1171_p1 = scmp.ne.s32.totalorder %s1169_s18, 1 }
  0x61   :  { %s293_s24 = scalar_lea.vmem (!%p1171_p1), %s1378_s4, %s1168_s17 }
  0x62   :  { %292 = sbr.rel (%p1171_p1) target bundleno = 106 (0x6a), region = 183  ;;  %v313_v6 = vld [vmem:[%s293_s24] sm:$0x1] (!%p1171_p1) }
  0x63   :  { %314 = vst [vmem:[#allocation2 + $0x2] sm:$0x1] (!%p1171_p1), %v313_v6 }
  0x69   :  { %339 = vsyncadd [#allocation3 + $0x2], 16 }
  0x6a PF:  { %s1172_s25 = sld [smem:[#allocation5 + $0x3]] }
  0x6b   :  { %s1173_s26 = sld [smem:[#allocation6 + $0x3]] }
  0x71   :  { %p1174_p2 = scmp.ne.s32.totalorder %s1173_s26, 0 }
  0x72   :  { %s347_s27 = scalar_lea.vmem (!%p1174_p2), %s1377_s3, %s1172_s25 }
  0x73   :  { %346 = sbr.rel (%p1174_p2) target bundleno = 123 (0x7b), region = 217  ;;  %v367_v7 = vld [vmem:[%s347_s27] sm:$0x1] (!%p1174_p2) }
  0x74   :  { %368 = vst [vmem:[#allocation2 + $0x3] sm:$0x1] (!%p1174_p2), %v367_v7 }
  0x7a   :  { %393 = vsyncadd [#allocation3 + $0x3], 16 }
  0x7b PF:  { %p1175_p3 = scmp.ne.s32.totalorder %s1173_s26, 1 }
  0x7c   :  { %s398_s30 = scalar_lea.vmem (!%p1175_p3), %s1378_s4, %s1172_s25 }
  0x7d   :  { %397 = sbr.rel (%p1175_p3) target bundleno = 133 (0x85), region = 251  ;;  %v418_v8 = vld [vmem:[%s398_s30] sm:$0x1] (!%p1175_p3) }
  0x7e   :  { %419 = vst [vmem:[#allocation2 + $0x3] sm:$0x1] (!%p1175_p3), %v418_v8 }
  0x84   :  { %444 = vsyncadd [#allocation3 + $0x3], 16 }
  0x85 PF:  { %s1176_s6 = sld [smem:[#allocation5 + $0x4]] }
  0x86   :  { %s1177_s7 = sld [smem:[#allocation6 + $0x4]] }
  0x8c   :  { %p1178_p4 = scmp.ne.s32.totalorder %s1177_s7, 0 }
  0x8d   :  { %s452_s10 = scalar_lea.vmem (!%p1178_p4), %s1377_s3, %s1176_s6 }
  0x8e   :  { %451 = sbr.rel (%p1178_p4) target bundleno = 150 (0x96), region = 285  ;;  %v472_v9 = vld [vmem:[%s452_s10] sm:$0x1] (!%p1178_p4) }
  0x8f   :  { %473 = vst [vmem:[#allocation2 + $0x4] sm:$0x1] (!%p1178_p4), %v472_v9 }
  0x95   :  { %498 = vsyncadd [#allocation3 + $0x4], 16 }
  0x96 PF:  { %p1179_p5 = scmp.ne.s32.totalorder %s1177_s7, 1 }
  0x97   :  { %s503_s13 = scalar_lea.vmem (!%p1179_p5), %s1378_s4, %s1176_s6 }
  0x98   :  { %502 = sbr.rel (%p1179_p5) target bundleno = 160 (0xa0), region = 319  ;;  %v523_v10 = vld [vmem:[%s503_s13] sm:$0x1] (!%p1179_p5) }
  0x99   :  { %524 = vst [vmem:[#allocation2 + $0x4] sm:$0x1] (!%p1179_p5), %v523_v10 }
  0x9f   :  { %549 = vsyncadd [#allocation3 + $0x4], 16 }
  0xa0 PF:  { %s1180_s14 = sld [smem:[#allocation5 + $0x5]] }
  0xa1   :  { %s1181_s15 = sld [smem:[#allocation6 + $0x5]] }
  0xa7   :  { %p1182_p6 = scmp.ne.s32.totalorder %s1181_s15, 0 }
  0xa8   :  { %s557_s18 = scalar_lea.vmem (!%p1182_p6), %s1377_s3, %s1180_s14 }
  0xa9   :  { %556 = sbr.rel (%p1182_p6) target bundleno = 177 (0xb1), region = 353  ;;  %v577_v11 = vld [vmem:[%s557_s18] sm:$0x1] (!%p1182_p6) }
  0xaa   :  { %578 = vst [vmem:[#allocation2 + $0x5] sm:$0x1] (!%p1182_p6), %v577_v11 }
  0xb0   :  { %603 = vsyncadd [#allocation3 + $0x5], 16 }
  0xb1 PF:  { %p1183_p7 = scmp.ne.s32.totalorder %s1181_s15, 1 }
  0xb2   :  { %s608_s21 = scalar_lea.vmem (!%p1183_p7), %s1378_s4, %s1180_s14 }
  0xb3   :  { %607 = sbr.rel (%p1183_p7) target bundleno = 187 (0xbb), region = 387  ;;  %v628_v12 = vld [vmem:[%s608_s21] sm:$0x1] (!%p1183_p7) }
  0xb4   :  { %629 = vst [vmem:[#allocation2 + $0x5] sm:$0x1] (!%p1183_p7), %v628_v12 }
  0xba   :  { %654 = vsyncadd [#allocation3 + $0x5], 16 }
  0xbb PF:  { %s1184_s22 = sld [smem:[#allocation5 + $0x6]] }
  0xbc   :  { %s1185_s23 = sld [smem:[#allocation6 + $0x6]] }
  0xc2   :  { %p1186_p8 = scmp.ne.s32.totalorder %s1185_s23, 0 }
  0xc3   :  { %s662_s26 = scalar_lea.vmem (!%p1186_p8), %s1377_s3, %s1184_s22 }
  0xc4   :  { %661 = sbr.rel (%p1186_p8) target bundleno = 204 (0xcc), region = 421  ;;  %v682_v13 = vld [vmem:[%s662_s26] sm:$0x1] (!%p1186_p8) }
  0xc5   :  { %683 = vst [vmem:[#allocation2 + $0x6] sm:$0x1] (!%p1186_p8), %v682_v13 }
  0xcb   :  { %708 = vsyncadd [#allocation3 + $0x6], 16 }
  0xcc PF:  { %p1187_p9 = scmp.ne.s32.totalorder %s1185_s23, 1 }
  0xcd   :  { %s713_s27 = scalar_lea.vmem (!%p1187_p9), %s1378_s4, %s1184_s22 }
  0xce   :  { %712 = sbr.rel (%p1187_p9) target bundleno = 214 (0xd6), region = 455  ;;  %v733_v14 = vld [vmem:[%s713_s27] sm:$0x1] (!%p1187_p9) }
  0xcf   :  { %734 = vst [vmem:[#allocation2 + $0x6] sm:$0x1] (!%p1187_p9), %v733_v14 }
  0xd5   :  { %759 = vsyncadd [#allocation3 + $0x6], 16 }
  0xd6 PF:  { %s1188_s28 = sld [smem:[#allocation5 + $0x7]] }
  0xd7   :  { %s1189_s29 = sld [smem:[#allocation6 + $0x7]] }
  0xdd   :  { %p1190_p10 = scmp.ne.s32.totalorder %s1189_s29, 0 }
  0xde   :  { %s767_s7 = scalar_lea.vmem (!%p1190_p10), %s1377_s3, %s1188_s28 }
  0xdf   :  { %766 = sbr.rel (%p1190_p10) target bundleno = 231 (0xe7), region = 489  ;;  %v787_v15 = vld [vmem:[%s767_s7] sm:$0x1] (!%p1190_p10) }
  0xe0   :  { %788 = vst [vmem:[#allocation2 + $0x7] sm:$0x1] (!%p1190_p10), %v787_v15 }
  0xe6   :  { %813 = vsyncadd [#allocation3 + $0x7], 16 }
  0xe7 PF:  { %p1191_p11 = scmp.ne.s32.totalorder %s1189_s29, 1 }
  0xe8   :  { %s818_s10 = scalar_lea.vmem (!%p1191_p11), %s1378_s4, %s1188_s28 }
  0xe9   :  { %817 = sbr.rel (%p1191_p11) target bundleno = 241 (0xf1), region = 523  ;;  %v838_v16 = vld [vmem:[%s818_s10] sm:$0x1] (!%p1191_p11) }
  0xea   :  { %839 = vst [vmem:[#allocation2 + $0x7] sm:$0x1] (!%p1191_p11), %v838_v16 }
  0xf0   :  { %864 = vsyncadd [#allocation3 + $0x7], 16 }
  0xf1 PF:  { %1252 = dma.done.wait [#allocation3], 16 }
  0xf2   :  { %1253 = vsyncadd [#allocation3], 4294967280 }
  0xf3   :  { %1254 = dma.done.wait [#allocation3 + $0x1], 16 }
  0xf4   :  { %1255 = vsyncadd [#allocation3 + $0x1], 4294967280 }
  0xf5   :  { %1256 = dma.done.wait [#allocation3 + $0x2], 16 }
  0xf6   :  { %1257 = vsyncadd [#allocation3 + $0x2], 4294967280 }
  0xf7   :  { %1258 = dma.done.wait [#allocation3 + $0x3], 16 }
  0xf8   :  { %1259 = vsyncadd [#allocation3 + $0x3], 4294967280 }
  0xf9   :  { %1260 = dma.done.wait [#allocation3 + $0x4], 16 }
  0xfa   :  { %1261 = vsyncadd [#allocation3 + $0x4], 4294967280 }
  0xfb   :  { %1262 = dma.done.wait [#allocation3 + $0x5], 16 }
  0xfc   :  { %1263 = vsyncadd [#allocation3 + $0x5], 4294967280 }
  0xfd   :  { %1264 = dma.done.wait [#allocation3 + $0x6], 16 }
  0xfe   :  { %1265 = vsyncadd [#allocation3 + $0x6], 4294967280 }
  0xff   :  { %1266 = dma.done.wait [#allocation3 + $0x7], 16 }
 0x100   :  { %1267 = vsyncadd [#allocation3 + $0x7], 4294967280  ;;  %v893_v17 = vlaneseq  ;;  %v889_v19 = vld [vmem:[%s1376_s2] sm:$0xff]  ;;  %v899_v23 = vld [vmem:[#allocation7] sm:$0xff]  ;;  %s1273_s11 = smov [#allocation7]  }
 0x101   :  { %v890_v20 = vld [vmem:[#allocation2] sm:$0xff]  ;;  %s909_s12 = sshll.u32 %s1273_s11, 4  ;;  %s910_s12 = int_to_ptr.vmem [resolvable:$true] %s909_s12 }
 0x102   :  { %v894_v18 = vshrl.u32 %v893_v17, 7  ;;  %v891_v21 = vsub.f32 %v889_v19, %v890_v20  ;;  %s1228_s13 = scalar_lea.vmem %s910_s12, 128  ;;  %p1233_p13 = scmp.lt.s32.totalorder %s910_s12, %s910_s12 }
 0x103   :  { %p1229_p12 = scmp.ne.s32.totalorder %s910_s12, %s1228_s13  ;;  %p1234_p0 = scmp.lt.s32.totalorder %s1228_s13, %s1228_s13 }
 0x104   :  { %vm897_vm1 = vcmp.lt.s32.totalorder %v894_v18, 4  ;;  %v892_v22 = vmul.f32 %v891_v21, %v891_v21 }
 0x105   :  { %p1235_p1 = por %p1234_p0, %p1233_p13 }
 0x106   :  { %v898_v24 = vsel %vm897_vm1, %v892_v22, 0.0 }
 0x107   :  { %v900_v25 = vadd.f32 %v899_v23, %v898_v24  ;;  %p1236_p2 = pnand %p1235_p1, %p1229_p12 }
 0x109   :  { %902 = vst.msk [vmem:[#allocation7] sm:$0xff] %vm28_vm0, %v900_v25 }
 0x10a   :  { %1239 = shalt.err (!%p1236_p2)
}
 0x10b   :  { %s1240_s15 = scalar_lea.hbm %s1379_s5, 128 }
 0x10c   :  { %p1241_p3 = scmp.ne.s32.totalorder %s1379_s5, %s1240_s15  ;;  %p1244_p4 = scmp.lt.u32.totalorder %s1240_s15, %s1379_s5 }
 0x10e   :  { %p1246_p5 = pnand %p1244_p4, %p1241_p3 }
 0x110   :  { %1249 = shalt.err (!%p1246_p5)
}
 0x111   :  { %912 = dma.vmem_to_hbm [thread:$0]  %s910_s12, 128, %s1379_s5, [#allocation8]  }
 0x112   :  { %1268 = dma.done.wait [#allocation8], 128  }
 0x113   :  { %1269 = vsyncadd [#allocation8], 4294967168 }
 0x114   :  { %916 = vsyncpa [#allocation8], 1 }
 0x115   :  { %917 = vsyncmov [#allocation3] }
 0x118   :  { %s918_s22 = vpop.sfrf %917 }
 0x119   :  { %p1192_p6 = scmp.ne.s32.totalorder %s918_s22, 0 }
 0x11b   :  { %922 = shalt.err (%p1192_p6)  }
 0x11c   :  { %924 = vsyncmov [#allocation3 + $0x1] }
 0x11f   :  { %s925_s23 = vpop.sfrf %924 }
 0x120   :  { %p1193_p7 = scmp.ne.s32.totalorder %s925_s23, 0 }
 0x122   :  { %929 = shalt.err (%p1193_p7)  }
 0x123   :  { %931 = vsyncmov [#allocation3 + $0x2] }
 0x126   :  { %s932_s24 = vpop.sfrf %931 }
 0x127   :  { %p1194_p8 = scmp.ne.s32.totalorder %s932_s24, 0 }
 0x129   :  { %936 = shalt.err (%p1194_p8)  }
 0x12a   :  { %938 = vsyncmov [#allocation3 + $0x3] }
 0x12d   :  { %s939_s25 = vpop.sfrf %938 }
 0x12e   :  { %p1195_p9 = scmp.ne.s32.totalorder %s939_s25, 0 }
 0x130   :  { %943 = shalt.err (%p1195_p9)  }
 0x131   :  { %945 = vsyncmov [#allocation3 + $0x4] }
 0x134   :  { %s946_s5 = vpop.sfrf %945 }
 0x135   :  { %p1196_p10 = scmp.ne.s32.totalorder %s946_s5, 0 }
 0x137   :  { %950 = shalt.err (%p1196_p10)  }
 0x138   :  { %952 = vsyncmov [#allocation3 + $0x5] }
 0x13b   :  { %s953_s26 = vpop.sfrf %952 }
 0x13c   :  { %p1197_p11 = scmp.ne.s32.totalorder %s953_s26, 0 }
 0x13e   :  { %957 = shalt.err (%p1197_p11)  }
 0x13f   :  { %959 = vsyncmov [#allocation3 + $0x6] }
 0x142   :  { %s960_s0 = vpop.sfrf %959 }
 0x143   :  { %p1198_p12 = scmp.ne.s32.totalorder %s960_s0, 0 }
 0x145   :  { %964 = shalt.err (%p1198_p12)  }
 0x146   :  { %966 = vsyncmov [#allocation3 + $0x7] }
 0x149   :  { %s967_s1 = vpop.sfrf %966 }
 0x14a   :  { %p1199_p13 = scmp.ne.s32.totalorder %s967_s1, 0 }
 0x14c   :  { %971 = shalt.err (%p1199_p13)  }

</bundles_post_ra>
